<compile_context>
chip_gen: v6e
topology: v6e:2x2x1
jax: 0.10.0
libtpu: 0.0.40
codegen_flags: <defaults>
</compile_context>

<pallas_src>
import jax
import jax.numpy as jnp
from jax import lax
from jax.experimental import pallas as pl
from jax.experimental.pallas import tpu as pltpu


def _fs2_loss_kernel(
    tgt_lens_ref,      # SMEM [B] i32 (scalar prefetch): # valid target frames per batch
    src_lens_ref,      # SMEM [B] i32 (scalar prefetch): # valid source tokens per batch
    mel_pred_ref,      # VMEM [TT, M]  native dtype (mel prediction block, batch b, tile ti)
    mel_tgt_ref,       # VMEM [TT, M]
    post_pred_ref,     # VMEM [TT, M]
    pitch_pred_ref,    # VMEM [1, T]   (per-batch resident block)
    pitch_tgt_ref,     # VMEM [1, T]
    energy_pred_ref,   # VMEM [1, T]
    energy_tgt_ref,    # VMEM [1, T]
    dur_pred_ref,      # VMEM [1, S]   (log-duration prediction)
    dur_tgt_ref,       # VMEM [1, S]   (raw duration; log(x+1) applied in-kernel)
    out_ref,           # VMEM [1, 128] f32 per-batch partial sums (lanes 0..4 used)
    acc_mel_ref,       # VMEM [1, M] f32 scratch: running sum |mel_pred - mel_tgt|
    acc_post_ref,      # VMEM [1, M] f32 scratch: running sum |mel_pred + post - mel_tgt|
):
    b = pl.program_id(0)
    ti = pl.program_id(1)
    nt = pl.num_programs(1)
    tt, _ = mel_pred_ref.shape

    # ---- per-batch accumulator reset -------------------------------------------
    @pl.when(ti == 0)
    def _init():
        acc_mel_ref[...] = jnp.zeros_like(acc_mel_ref)
        acc_post_ref[...] = jnp.zeros_like(acc_post_ref)

    # ---- hot loop: masked L1 partial sums for this (batch, frame-tile) block ----
    # TODO(synk): on v6e/v7x the diff/abs could run in bf16 (native bf16 VALU) and
    # upcast only at the accumulate; kept f32 here for bit-for-bit parity with the
    # reference and v5e safety.
    mel_p = mel_pred_ref[...].astype(jnp.float32)
    mel_t = mel_tgt_ref[...].astype(jnp.float32)
    post_p = post_pred_ref[...].astype(jnp.float32)

    # Frame validity rebuilt in-kernel: frame index < valid length of batch b.
    frame_idx = ti * tt + lax.broadcasted_iota(jnp.int32, (tt, 1), 0)   # [TT, 1]
    valid = frame_idx < tgt_lens_ref[b]                                  # [TT, 1] bool

    d = mel_p - mel_t                        # reused for the postnet residual
    abs_mel = jnp.where(valid, jnp.abs(d), 0.0)
    abs_post = jnp.where(valid, jnp.abs(d + post_p), 0.0)

    # Small accumulators: reduce over the sublane (frame) axis per block, then add.
    acc_mel_ref[...] += jnp.sum(abs_mel, axis=0, keepdims=True)
    acc_post_ref[...] += jnp.sum(abs_post, axis=0, keepdims=True)

    # ---- per-batch finalize: small MSE terms + lane reduce + partial-sum output --
    @pl.when(ti == nt - 1)
    def _finalize():
        T = pitch_pred_ref.shape[1]
        S = dur_pred_ref.shape[1]

        t_idx = lax.broadcasted_iota(jnp.int32, (1, T), 1)
        t_valid = t_idx < tgt_lens_ref[b]
        s_idx = lax.broadcasted_iota(jnp.int32, (1, S), 1)
        s_valid = s_idx < src_lens_ref[b]

        mel_s = jnp.sum(acc_mel_ref[...])
        post_s = jnp.sum(acc_post_ref[...])

        pitch_d = (pitch_pred_ref[...].astype(jnp.float32)
                   - pitch_tgt_ref[...].astype(jnp.float32))
        pitch_s = jnp.sum(jnp.where(t_valid, pitch_d * pitch_d, 0.0))

        energy_d = (energy_pred_ref[...].astype(jnp.float32)
                    - energy_tgt_ref[...].astype(jnp.float32))
        energy_s = jnp.sum(jnp.where(t_valid, energy_d * energy_d, 0.0))

        dur_d = dur_pred_ref[...].astype(jnp.float32) - jnp.log(
            dur_tgt_ref[...].astype(jnp.float32) + 1.0)
        dur_s = jnp.sum(jnp.where(s_valid, dur_d * dur_d, 0.0))

        lane = lax.broadcasted_iota(jnp.int32, (1, 128), 1)
        out_ref[...] = jnp.where(
            lane == 0, mel_s,
            jnp.where(lane == 1, post_s,
                      jnp.where(lane == 2, pitch_s,
                                jnp.where(lane == 3, energy_s,
                                          jnp.where(lane == 4, dur_s, 0.0)))))


def _round_up(x, m):
    return ((x + m - 1) // m) * m


def fastspeech2_loss(pred, truth, src_mask, tgt_mask, tgt_max_length=None, block_t=4096):
    """pred/truth are dicts of jnp arrays (any float dtype; bf16 recommended);
    src_mask/tgt_mask are bool with True = PAD (standard FastSpeech2 length masks,
    assumed contiguous length-style padding)."""
    mel_pred = pred["mel"]                  # [B, T, M]
    pitch_pred = pred["pitch"]              # [B, T]
    energy_pred = pred["energy"]            # [B, T]
    dur_pred = pred["log_duration"]         # [B, S]
    post_pred = pred["postnet_output"]      # [B, T, M]

    mel_tgt = truth["mel"]
    pitch_tgt = truth["pitch"]
    energy_tgt = truth["energy"]
    dur_tgt = truth["duration"]

    # Optional target-length slicing (module semantics).  Slice every T-length
    # tensor together so shapes/masks stay consistent (preds are usually already
    # tgt_max_length long, so this is a no-op for them).
    if tgt_max_length is not None:
        L = tgt_max_length
        mel_pred = mel_pred[:, :L, :]
        post_pred = post_pred[:, :L, :]
        pitch_pred = pitch_pred[:, :L]
        energy_pred = energy_pred[:, :L]
        mel_tgt = mel_tgt[:, :L, :]
        pitch_tgt = pitch_tgt[:, :L]       # variance_level == 'frame'
        energy_tgt = energy_tgt[:, :L]
        tgt_mask = tgt_mask[:, :L]

    B, T, M = mel_pred.shape
    S = dur_pred.shape[1]

    # Per-batch valid lengths (contiguous padding masks assumed: lens == sum(~mask)).
    tgt_lens = jnp.sum(~tgt_mask, axis=1).astype(jnp.int32)   # [B]
    src_lens = jnp.sum(~src_mask, axis=1).astype(jnp.int32)   # [B]

    # ---- frame tile selection: big, balanced, VMEM-budgeted ----------------------
    bytes_per_row = M * 2 * (jnp.dtype(mel_pred.dtype).itemsize
                             + jnp.dtype(mel_tgt.dtype).itemsize
                             + jnp.dtype(post_pred.dtype).itemsize)
    vmem_budget = 20 * 1024 * 1024                      # for the 3 double-buffered mel streams
    max_tt = max(8, ((vmem_budget // max(bytes_per_row, 1)) // 8) * 8)
    eff_block_t = min(block_t, max_tt)
    if T <= eff_block_t:
        tt = T
        n_t = 1
    else:
        n_t = pl.cdiv(T, eff_block_t)
        tt = _round_up(pl.cdiv(T, n_t), 8)              # balanced tiles, sublane aligned
        n_t = pl.cdiv(T, tt)

    # TODO(synk): v7x micro-opt — flatten the mel tensors to a lane-dense [rows,128]
    # layout (80 mel bins only fill 62% of each vreg); needs a flat-index mask.

    # Reshape small per-frame / per-token arrays to (B, 1, X) so their per-batch
    # blocks are clean 2-D (1, X) refs with full last-two dims.
    pitch_pred3 = pitch_pred[:, None, :]
    pitch_tgt3 = pitch_tgt[:, None, :]
    energy_pred3 = energy_pred[:, None, :]
    energy_tgt3 = energy_tgt[:, None, :]
    dur_pred3 = dur_pred[:, None, :]
    dur_tgt3 = dur_tgt[:, None, :]

    mel_spec = pl.BlockSpec((None, tt, M), lambda b, t, *_: (b, t, 0))
    bt_spec = pl.BlockSpec((None, 1, T), lambda b, t, *_: (b, 0, 0))
    bs_spec = pl.BlockSpec((None, 1, S), lambda b, t, *_: (b, 0, 0))
    out_spec = pl.BlockSpec((None, 1, 128), lambda b, t, *_: (b, 0, 0))

    grid_spec = pltpu.PrefetchScalarGridSpec(
        num_scalar_prefetch=2,
        grid=(B, n_t),
        in_specs=[mel_spec, mel_spec, mel_spec,
                  bt_spec, bt_spec, bt_spec, bt_spec,
                  bs_spec, bs_spec],
        out_specs=out_spec,
        scratch_shapes=[pltpu.VMEM((1, M), jnp.float32),
                        pltpu.VMEM((1, M), jnp.float32)],
    )

    mel_bytes = jnp.dtype(mel_pred.dtype).itemsize
    cost = pl.CostEstimate(
        flops=int(8 * B * T * M + 10 * B * T + 5 * B * S),
        transcendentals=int(B * S),
        bytes_accessed=int(3 * B * T * M * mel_bytes + 4 * B * T * 4 + 2 * B * S * 4),
    )

    partials = pl.pallas_call(
        _fs2_loss_kernel,
        out_shape=jax.ShapeDtypeStruct((B, 1, 128), jnp.float32),
        grid_spec=grid_spec,
        compiler_params=pltpu.CompilerParams(
            # Per-batch partial sums -> batch axis is independent; on v7x the two
            # TensorCores each stream half the batches.  Frame-tile axis carries
            # the accumulators -> arbitrary.
            dimension_semantics=("parallel", "arbitrary"),
            vmem_limit_bytes=32 * 1024 * 1024,
        ),
        cost_estimate=cost,
    )(
        tgt_lens, src_lens,
        mel_pred, mel_tgt, post_pred,
        pitch_pred3, pitch_tgt3, energy_pred3, energy_tgt3,
        dur_pred3, dur_tgt3,
    )

    # ---- tiny wrapper-side combine: 5 sums, 2 counts, 6 divides/adds -------------
    mel_sum = jnp.sum(partials[:, 0, 0])
    post_sum = jnp.sum(partials[:, 0, 1])
    pitch_sum = jnp.sum(partials[:, 0, 2])
    energy_sum = jnp.sum(partials[:, 0, 3])
    dur_sum = jnp.sum(partials[:, 0, 4])

    tgt_count = jnp.sum(tgt_lens).astype(jnp.float32)
    src_count = jnp.sum(src_lens).astype(jnp.float32)
    fm = jnp.float32(M)

    mel_loss = mel_sum / (tgt_count * fm)
    postnet_loss = post_sum / (tgt_count * fm)
    pitch_loss = pitch_sum / tgt_count
    energy_loss = energy_sum / tgt_count
    duration_loss = dur_sum / src_count
    total = mel_loss + pitch_loss + energy_loss + duration_loss + postnet_loss

    # [total, mel, pitch, energy, duration, postnet]
    return jnp.stack([total, mel_loss, pitch_loss, energy_loss, duration_loss, postnet_loss])


def _reference_loss(pred, truth, src_mask, tgt_mask):
    """Plain-JAX reference mirroring the PyTorch masked_select semantics."""
    tgt_v = (~tgt_mask).astype(jnp.float32)
    src_v = (~src_mask).astype(jnp.float32)
    M = pred["mel"].shape[-1]
    tgt_cnt = jnp.sum(tgt_v)
    src_cnt = jnp.sum(src_v)

    mel_loss = jnp.sum(jnp.abs(pred["mel"] - truth["mel"]) * tgt_v[..., None]) / (tgt_cnt * M)
    post_loss = jnp.sum(
        jnp.abs(pred["mel"] + pred["postnet_output"] - truth["mel"]) * tgt_v[..., None]
    ) / (tgt_cnt * M)
    pitch_loss = jnp.sum((pred["pitch"] - truth["pitch"]) ** 2 * tgt_v) / tgt_cnt
    energy_loss = jnp.sum((pred["energy"] - truth["energy"]) ** 2 * tgt_v) / tgt_cnt
    dur_loss = jnp.sum(
        (pred["log_duration"] - jnp.log(truth["duration"].astype(jnp.float32) + 1.0)) ** 2 * src_v
    ) / src_cnt
    total = mel_loss + pitch_loss + energy_loss + dur_loss + post_loss
    return jnp.stack([total, mel_loss, pitch_loss, energy_loss, dur_loss, post_loss])


if __name__ == "__main__":
    key = jax.random.PRNGKey(0)
    B, T, M, S = 2, 16, 8, 8   # batch, target frames, mel bins, source tokens

    ks = jax.random.split(key, 10)
    pred = {
        "mel": jax.random.normal(ks[0], (B, T, M), jnp.float32),
        "pitch": jax.random.normal(ks[1], (B, T), jnp.float32),
        "energy": jax.random.normal(ks[2], (B, T), jnp.float32),
        "log_duration": jax.random.normal(ks[3], (B, S), jnp.float32),
        "snr": jnp.zeros((B, T), jnp.float32),            # unused (use_snr=False)
        "postnet_output": 0.1 * jax.random.normal(ks[4], (B, T, M), jnp.float32),
    }
    truth = {
        "mel": jax.random.normal(ks[5], (B, T, M), jnp.float32),
        "pitch": jax.random.normal(ks[6], (B, T), jnp.float32),
        "energy": jax.random.normal(ks[7], (B, T), jnp.float32),
        "duration": jax.random.randint(ks[8], (B, S), 1, 6).astype(jnp.float32),
    }

    # True = padding (matches the PyTorch convention: masks are inverted in forward()).
    tgt_lens = jnp.array([16, 12])
    src_lens = jnp.array([8, 6])
    tgt_mask = jnp.arange(T)[None, :] >= tgt_lens[:, None]   # [B, T] bool
    src_mask = jnp.arange(S)[None, :] >= src_lens[:, None]   # [B, S] bool

    losses = fastspeech2_loss(pred, truth, src_mask, tgt_mask)
    losses = jax.block_until_ready(losses)

    ref = _reference_loss(pred, truth, src_mask, tgt_mask)
    assert jnp.allclose(losses, ref, rtol=1e-5, atol=1e-5), (losses, ref)

    # TODO(synk): snr branch (use_snr=True) and variance_level='phoneme' path omitted;
    # each would be one more masked MSE term in the per-batch finalize.
    print("KERNEL_OK")
</pallas_src>

<mosaic_0001>
module attributes {stable_mosaic.version = 11 : i64} {
  func.func @_fs2_loss_kernel(%arg0: i32, %arg1: i32, %arg2: memref<2xi32, #tpu.memory_space<smem>>, %arg3: memref<2xi32, #tpu.memory_space<smem>>, %arg4: memref<1x16x8xf32, #tpu.memory_space<vmem>>, %arg5: memref<1x16x8xf32, #tpu.memory_space<vmem>>, %arg6: memref<1x16x8xf32, #tpu.memory_space<vmem>>, %arg7: memref<1x1x16xf32, #tpu.memory_space<vmem>>, %arg8: memref<1x1x16xf32, #tpu.memory_space<vmem>>, %arg9: memref<1x1x16xf32, #tpu.memory_space<vmem>>, %arg10: memref<1x1x16xf32, #tpu.memory_space<vmem>>, %arg11: memref<1x1x8xf32, #tpu.memory_space<vmem>>, %arg12: memref<1x1x8xf32, #tpu.memory_space<vmem>>, %arg13: memref<1x1x128xf32, #tpu.memory_space<vmem>>, %arg14: memref<1x8xf32, #tpu.memory_space<vmem>>, %arg15: memref<1x8xf32, #tpu.memory_space<vmem>>) attributes {dimension_semantics = [#tpu.dimension_semantics<parallel>, #tpu.dimension_semantics<arbitrary>], iteration_bounds = array<i64: 2, 1>, scalar_prefetch = 2 : i64, scratch_operands = 2 : i64, tpu.core_type = #tpu.core_type<tc>, window_params = [{transform_indices = @transform_0, window_bounds = array<i64: 1, 16, 8>}, {transform_indices = @transform_1, window_bounds = array<i64: 1, 16, 8>}, {transform_indices = @transform_2, window_bounds = array<i64: 1, 16, 8>}, {transform_indices = @transform_3, window_bounds = array<i64: 1, 1, 16>}, {transform_indices = @transform_4, window_bounds = array<i64: 1, 1, 16>}, {transform_indices = @transform_5, window_bounds = array<i64: 1, 1, 16>}, {transform_indices = @transform_6, window_bounds = array<i64: 1, 1, 16>}, {transform_indices = @transform_7, window_bounds = array<i64: 1, 1, 8>}, {transform_indices = @transform_8, window_bounds = array<i64: 1, 1, 8>}, {transform_indices = @transform_9, window_bounds = array<i64: 1, 1, 128>}]} {
    %c0_i32 = arith.constant 0 : i32
    %0 = arith.cmpi eq, %arg1, %c0_i32 : i32
    %1 = arith.extui %0 : i1 to i32
    %c0_i32_0 = arith.constant 0 : i32
    %2 = arith.cmpi ne, %1, %c0_i32_0 : i32
    scf.if %2 {
      %cst_22 = arith.constant 0.000000e+00 : f32
      %42 = vector.broadcast %cst_22 : f32 to vector<1x8xf32>
      %c0_23 = arith.constant 0 : index
      %c0_24 = arith.constant 0 : index
      %43 = vector.load %arg14[%c0_23, %c0_24] : memref<1x8xf32, #tpu.memory_space<vmem>>, vector<1x8xf32>
      tpu.vector_store %arg14[%c0_23, %c0_24], %42 {strides = array<i32>} : memref<1x8xf32, #tpu.memory_space<vmem>>, vector<1x8xf32>,
      %cst_25 = arith.constant 0.000000e+00 : f32
      %44 = vector.broadcast %cst_25 : f32 to vector<1x8xf32>
      %c0_26 = arith.constant 0 : index
      %c0_27 = arith.constant 0 : index
      %45 = vector.load %arg15[%c0_26, %c0_27] : memref<1x8xf32, #tpu.memory_space<vmem>>, vector<1x8xf32>
      tpu.vector_store %arg15[%c0_26, %c0_27], %44 {strides = array<i32>} : memref<1x8xf32, #tpu.memory_space<vmem>>, vector<1x8xf32>,
    } else {
    }
    %c0 = arith.constant 0 : index
    %c0_1 = arith.constant 0 : index
    %c0_2 = arith.constant 0 : index
    %3 = vector.load %arg4[%c0, %c0_1, %c0_2] : memref<1x16x8xf32, #tpu.memory_space<vmem>>, vector<1x16x8xf32>
    %4 = vector.shape_cast %3 : vector<1x16x8xf32> to vector<16x8xf32>
    %c0_3 = arith.constant 0 : index
    %c0_4 = arith.constant 0 : index
    %c0_5 = arith.constant 0 : index
    %5 = vector.load %arg5[%c0_3, %c0_4, %c0_5] : memref<1x16x8xf32, #tpu.memory_space<vmem>>, vector<1x16x8xf32>
    %6 = vector.shape_cast %5 : vector<1x16x8xf32> to vector<16x8xf32>
    %c0_6 = arith.constant 0 : index
    %c0_7 = arith.constant 0 : index
    %c0_8 = arith.constant 0 : index
    %7 = vector.load %arg6[%c0_6, %c0_7, %c0_8] : memref<1x16x8xf32, #tpu.memory_space<vmem>>, vector<1x16x8xf32>
    %8 = vector.shape_cast %7 : vector<1x16x8xf32> to vector<16x8xf32>
    %c16_i32 = arith.constant 16 : i32
    %9 = arith.muli %arg1, %c16_i32 : i32
    %10 = tpu.iota {dimensions = array<i32: 0>} : vector<16x1xi32>
    %11 = vector.broadcast %9 : i32 to vector<16x1xi32>
    %12 = arith.addi %11, %10 : vector<16x1xi32>
    %13 = arith.index_cast %arg0 : i32 to index
    %14 = memref.load %arg2[%13] : memref<2xi32, #tpu.memory_space<smem>>
    %15 = vector.broadcast %14 : i32 to vector<16x1xi32>
    %16 = arith.cmpi slt, %12, %15 : vector<16x1xi32>
    %17 = arith.subf %4, %6 : vector<16x8xf32>
    %18 = math.absf %17 : vector<16x8xf32>
    %cst = arith.constant 0.000000e+00 : f32
    %19 = vector.shape_cast %16 : vector<16x1xi1> to vector<16x1xi1>
    %20 = vector.broadcast %19 : vector<16x1xi1> to vector<16x8xi1>
    %21 = vector.broadcast %cst : f32 to vector<16x8xf32>
    %22 = arith.select %20, %18, %21 : vector<16x8xi1>, vector<16x8xf32>
    %23 = arith.addf %17, %8 : vector<16x8xf32>
    %24 = math.absf %23 : vector<16x8xf32>
    %cst_9 = arith.constant 0.000000e+00 : f32
    %25 = vector.shape_cast %16 : vector<16x1xi1> to vector<16x1xi1>
    %26 = vector.broadcast %25 : vector<16x1xi1> to vector<16x8xi1>
    %27 = vector.broadcast %cst_9 : f32 to vector<16x8xf32>
    %28 = arith.select %26, %24, %27 : vector<16x8xi1>, vector<16x8xf32>
    %c0_10 = arith.constant 0 : index
    %c0_11 = arith.constant 0 : index
    %29 = vector.load %arg14[%c0_10, %c0_11] : memref<1x8xf32, #tpu.memory_space<vmem>>, vector<1x8xf32>
    %cst_12 = arith.constant dense<0.000000e+00> : vector<8xf32>
    %30 = vector.multi_reduction <add>, %22, %cst_12 [0] : vector<16x8xf32> to vector<8xf32>
    %31 = vector.shape_cast %30 : vector<8xf32> to vector<1x8xf32>
    %32 = arith.addf %29, %31 : vector<1x8xf32>
    %c0_13 = arith.constant 0 : index
    %c0_14 = arith.constant 0 : index
    %33 = vector.load %arg14[%c0_13, %c0_14] : memref<1x8xf32, #tpu.memory_space<vmem>>, vector<1x8xf32>
    tpu.vector_store %arg14[%c0_13, %c0_14], %32 {strides = array<i32>} : memref<1x8xf32, #tpu.memory_space<vmem>>, vector<1x8xf32>,
    %c0_15 = arith.constant 0 : index
    %c0_16 = arith.constant 0 : index
    %34 = vector.load %arg15[%c0_15, %c0_16] : memref<1x8xf32, #tpu.memory_space<vmem>>, vector<1x8xf32>
    %cst_17 = arith.constant dense<0.000000e+00> : vector<8xf32>
    %35 = vector.multi_reduction <add>, %28, %cst_17 [0] : vector<16x8xf32> to vector<8xf32>
    %36 = vector.shape_cast %35 : vector<8xf32> to vector<1x8xf32>
    %37 = arith.addf %34, %36 : vector<1x8xf32>
    %c0_18 = arith.constant 0 : index
    %c0_19 = arith.constant 0 : index
    %38 = vector.load %arg15[%c0_18, %c0_19] : memref<1x8xf32, #tpu.memory_space<vmem>>, vector<1x8xf32>
    tpu.vector_store %arg15[%c0_18, %c0_19], %37 {strides = array<i32>} : memref<1x8xf32, #tpu.memory_space<vmem>>, vector<1x8xf32>,
    %c0_i32_20 = arith.constant 0 : i32
    %39 = arith.cmpi eq, %arg1, %c0_i32_20 : i32
    %40 = arith.extui %39 : i1 to i32
    %c0_i32_21 = arith.constant 0 : i32
    %41 = arith.cmpi ne, %40, %c0_i32_21 : i32
    scf.if %41 {
      %42 = tpu.iota {dimensions = array<i32: 1>} : vector<1x16xi32>
      %43 = arith.index_cast %arg0 : i32 to index
      %44 = memref.load %arg2[%43] : memref<2xi32, #tpu.memory_space<smem>>
      %45 = vector.broadcast %44 : i32 to vector<1x16xi32>
      %46 = arith.cmpi slt, %42, %45 : vector<1x16xi32>
      %47 = tpu.iota {dimensions = array<i32: 1>} : vector<1x8xi32>
      %48 = arith.index_cast %arg0 : i32 to index
      %49 = memref.load %arg3[%48] : memref<2xi32, #tpu.memory_space<smem>>
      %50 = vector.broadcast %49 : i32 to vector<1x8xi32>
      %51 = arith.cmpi slt, %47, %50 : vector<1x8xi32>
      %c0_22 = arith.constant 0 : index
      %c0_23 = arith.constant 0 : index
      %52 = vector.load %arg14[%c0_22, %c0_23] : memref<1x8xf32, #tpu.memory_space<vmem>>, vector<1x8xf32>
      %53 = vector.shape_cast %52 : vector<1x8xf32> to vector<1x1x8xf32>
      %cst_24 = arith.constant dense<0.000000e+00> : vector<1xf32>
      %54 = vector.multi_reduction <add>, %53, %cst_24 [1, 2] : vector<1x1x8xf32> to vector<1xf32>
      %55 = vector.shape_cast %54 : vector<1xf32> to vector<1x1x1xf32>
      %56 = vector.extract %55[0, 0, 0] : f32 from vector<1x1x1xf32>
      %c0_25 = arith.constant 0 : index
      %c0_26 = arith.constant 0 : index
      %57 = vector.load %arg15[%c0_25, %c0_26] : memref<1x8xf32, #tpu.memory_space<vmem>>, vector<1x8xf32>
      %58 = vector.shape_cast %57 : vector<1x8xf32> to vector<1x1x8xf32>
      %cst_27 = arith.constant dense<0.000000e+00> : vector<1xf32>
      %59 = vector.multi_reduction <add>, %58, %cst_27 [1, 2] : vector<1x1x8xf32> to vector<1xf32>
      %60 = vector.shape_cast %59 : vector<1xf32> to vector<1x1x1xf32>
      %61 = vector.extract %60[0, 0, 0] : f32 from vector<1x1x1xf32>
      %c0_28 = arith.constant 0 : index
      %c0_29 = arith.constant 0 : index
      %c0_30 = arith.constant 0 : index
      %62 = vector.load %arg7[%c0_28, %c0_29, %c0_30] : memref<1x1x16xf32, #tpu.memory_space<vmem>>, vector<1x1x16xf32>
      %63 = vector.shape_cast %62 : vector<1x1x16xf32> to vector<1x16xf32>
      %c0_31 = arith.constant 0 : index
      %c0_32 = arith.constant 0 : index
      %c0_33 = arith.constant 0 : index
      %64 = vector.load %arg8[%c0_31, %c0_32, %c0_33] : memref<1x1x16xf32, #tpu.memory_space<vmem>>, vector<1x1x16xf32>
      %65 = vector.shape_cast %64 : vector<1x1x16xf32> to vector<1x16xf32>
      %66 = arith.subf %63, %65 : vector<1x16xf32>
      %67 = arith.mulf %66, %66 : vector<1x16xf32>
      %cst_34 = arith.constant 0.000000e+00 : f32
      %68 = vector.broadcast %cst_34 : f32 to vector<1x16xf32>
      %69 = arith.select %46, %67, %68 : vector<1x16xi1>, vector<1x16xf32>
      %70 = vector.shape_cast %69 : vector<1x16xf32> to vector<1x1x16xf32>
      %cst_35 = arith.constant dense<0.000000e+00> : vector<1xf32>
      %71 = vector.multi_reduction <add>, %70, %cst_35 [1, 2] : vector<1x1x16xf32> to vector<1xf32>
      %72 = vector.shape_cast %71 : vector<1xf32> to vector<1x1x1xf32>
      %73 = vector.extract %72[0, 0, 0] : f32 from vector<1x1x1xf32>
      %c0_36 = arith.constant 0 : index
      %c0_37 = arith.constant 0 : index
      %c0_38 = arith.constant 0 : index
      %74 = vector.load %arg9[%c0_36, %c0_37, %c0_38] : memref<1x1x16xf32, #tpu.memory_space<vmem>>, vector<1x1x16xf32>
      %75 = vector.shape_cast %74 : vector<1x1x16xf32> to vector<1x16xf32>
      %c0_39 = arith.constant 0 : index
      %c0_40 = arith.constant 0 : index
      %c0_41 = arith.constant 0 : index
      %76 = vector.load %arg10[%c0_39, %c0_40, %c0_41] : memref<1x1x16xf32, #tpu.memory_space<vmem>>, vector<1x1x16xf32>
      %77 = vector.shape_cast %76 : vector<1x1x16xf32> to vector<1x16xf32>
      %78 = arith.subf %75, %77 : vector<1x16xf32>
      %79 = arith.mulf %78, %78 : vector<1x16xf32>
      %cst_42 = arith.constant 0.000000e+00 : f32
      %80 = vector.broadcast %cst_42 : f32 to vector<1x16xf32>
      %81 = arith.select %46, %79, %80 : vector<1x16xi1>, vector<1x16xf32>
      %82 = vector.shape_cast %81 : vector<1x16xf32> to vector<1x1x16xf32>
      %cst_43 = arith.constant dense<0.000000e+00> : vector<1xf32>
      %83 = vector.multi_reduction <add>, %82, %cst_43 [1, 2] : vector<1x1x16xf32> to vector<1xf32>
      %84 = vector.shape_cast %83 : vector<1xf32> to vector<1x1x1xf32>
      %85 = vector.extract %84[0, 0, 0] : f32 from vector<1x1x1xf32>
      %c0_44 = arith.constant 0 : index
      %c0_45 = arith.constant 0 : index
      %c0_46 = arith.constant 0 : index
      %86 = vector.load %arg11[%c0_44, %c0_45, %c0_46] : memref<1x1x8xf32, #tpu.memory_space<vmem>>, vector<1x1x8xf32>
      %87 = vector.shape_cast %86 : vector<1x1x8xf32> to vector<1x8xf32>
      %c0_47 = arith.constant 0 : index
      %c0_48 = arith.constant 0 : index
      %c0_49 = arith.constant 0 : index
      %88 = vector.load %arg12[%c0_47, %c0_48, %c0_49] : memref<1x1x8xf32, #tpu.memory_space<vmem>>, vector<1x1x8xf32>
      %89 = vector.shape_cast %88 : vector<1x1x8xf32> to vector<1x8xf32>
      %cst_50 = arith.constant 1.000000e+00 : f32
      %90 = vector.broadcast %cst_50 : f32 to vector<1x8xf32>
      %91 = arith.addf %89, %90 : vector<1x8xf32>
      %92 = math.log %91 : vector<1x8xf32>
      %93 = arith.subf %87, %92 : vector<1x8xf32>
      %94 = arith.mulf %93, %93 : vector<1x8xf32>
      %cst_51 = arith.constant 0.000000e+00 : f32
      %95 = vector.broadcast %cst_51 : f32 to vector<1x8xf32>
      %96 = arith.select %51, %94, %95 : vector<1x8xi1>, vector<1x8xf32>
      %97 = vector.shape_cast %96 : vector<1x8xf32> to vector<1x1x8xf32>
      %cst_52 = arith.constant dense<0.000000e+00> : vector<1xf32>
      %98 = vector.multi_reduction <add>, %97, %cst_52 [1, 2] : vector<1x1x8xf32> to vector<1xf32>
      %99 = vector.shape_cast %98 : vector<1xf32> to vector<1x1x1xf32>
      %100 = vector.extract %99[0, 0, 0] : f32 from vector<1x1x1xf32>
      %101 = tpu.iota {dimensions = array<i32: 1>} : vector<1x128xi32>
      %c0_i32_53 = arith.constant 0 : i32
      %102 = vector.broadcast %c0_i32_53 : i32 to vector<1x128xi32>
      %103 = arith.cmpi eq, %101, %102 : vector<1x128xi32>
      %c1_i32 = arith.constant 1 : i32
      %104 = vector.broadcast %c1_i32 : i32 to vector<1x128xi32>
      %105 = arith.cmpi eq, %101, %104 : vector<1x128xi32>
      %c2_i32 = arith.constant 2 : i32
      %106 = vector.broadcast %c2_i32 : i32 to vector<1x128xi32>
      %107 = arith.cmpi eq, %101, %106 : vector<1x128xi32>
      %c3_i32 = arith.constant 3 : i32
      %108 = vector.broadcast %c3_i32 : i32 to vector<1x128xi32>
      %109 = arith.cmpi eq, %101, %108 : vector<1x128xi32>
      %c4_i32 = arith.constant 4 : i32
      %110 = vector.broadcast %c4_i32 : i32 to vector<1x128xi32>
      %111 = arith.cmpi eq, %101, %110 : vector<1x128xi32>
      %cst_54 = arith.constant 0.000000e+00 : f32
      %112 = vector.broadcast %100 : f32 to vector<1x128xf32>
      %113 = vector.broadcast %cst_54 : f32 to vector<1x128xf32>
      %114 = arith.select %111, %112, %113 : vector<1x128xi1>, vector<1x128xf32>
      %115 = vector.broadcast %85 : f32 to vector<1x128xf32>
      %116 = arith.select %109, %115, %114 : vector<1x128xi1>, vector<1x128xf32>
      %117 = vector.broadcast %73 : f32 to vector<1x128xf32>
      %118 = arith.select %107, %117, %116 : vector<1x128xi1>, vector<1x128xf32>
      %119 = vector.broadcast %61 : f32 to vector<1x128xf32>
      %120 = arith.select %105, %119, %118 : vector<1x128xi1>, vector<1x128xf32>
      %121 = vector.broadcast %56 : f32 to vector<1x128xf32>
      %122 = arith.select %103, %121, %120 : vector<1x128xi1>, vector<1x128xf32>
      %c0_55 = arith.constant 0 : index
      %c0_56 = arith.constant 0 : index
      %c0_57 = arith.constant 0 : index
      %123 = vector.load %arg13[%c0_55, %c0_56, %c0_57] : memref<1x1x128xf32, #tpu.memory_space<vmem>>, vector<1x1x128xf32>
      %124 = vector.shape_cast %123 : vector<1x1x128xf32> to vector<1x128xf32>
      %125 = vector.shape_cast %122 : vector<1x128xf32> to vector<1x1x128xf32>
      tpu.vector_store %arg13[%c0_55, %c0_56, %c0_57], %125 {strides = array<i32>} : memref<1x1x128xf32, #tpu.memory_space<vmem>>, vector<1x1x128xf32>,
    } else {
    }
    return
  }
  func.func @transform_0(%arg0: i32, %arg1: i32, %arg2: memref<2xi32, #tpu.memory_space<smem>>, %arg3: memref<2xi32, #tpu.memory_space<smem>>) -> (i32, i32, i32) {
    %c0_i32 = arith.constant 0 : i32
    %c0_i32_0 = arith.constant 0 : i32
    return %arg0, %arg1, %c0_i32 : i32, i32, i32
  }
  func.func @transform_1(%arg0: i32, %arg1: i32, %arg2: memref<2xi32, #tpu.memory_space<smem>>, %arg3: memref<2xi32, #tpu.memory_space<smem>>) -> (i32, i32, i32) {
    %c0_i32 = arith.constant 0 : i32
    %c0_i32_0 = arith.constant 0 : i32
    return %arg0, %arg1, %c0_i32 : i32, i32, i32
  }
  func.func @transform_2(%arg0: i32, %arg1: i32, %arg2: memref<2xi32, #tpu.memory_space<smem>>, %arg3: memref<2xi32, #tpu.memory_space<smem>>) -> (i32, i32, i32) {
    %c0_i32 = arith.constant 0 : i32
    %c0_i32_0 = arith.constant 0 : i32
    return %arg0, %arg1, %c0_i32 : i32, i32, i32
  }
  func.func @transform_3(%arg0: i32, %arg1: i32, %arg2: memref<2xi32, #tpu.memory_space<smem>>, %arg3: memref<2xi32, #tpu.memory_space<smem>>) -> (i32, i32, i32) {
    %c0_i32 = arith.constant 0 : i32
    %c0_i32_0 = arith.constant 0 : i32
    %c0_i32_1 = arith.constant 0 : i32
    return %arg0, %c0_i32, %c0_i32_0 : i32, i32, i32
  }
  func.func @transform_4(%arg0: i32, %arg1: i32, %arg2: memref<2xi32, #tpu.memory_space<smem>>, %arg3: memref<2xi32, #tpu.memory_space<smem>>) -> (i32, i32, i32) {
    %c0_i32 = arith.constant 0 : i32
    %c0_i32_0 = arith.constant 0 : i32
    %c0_i32_1 = arith.constant 0 : i32
    return %arg0, %c0_i32, %c0_i32_0 : i32, i32, i32
  }
  func.func @transform_5(%arg0: i32, %arg1: i32, %arg2: memref<2xi32, #tpu.memory_space<smem>>, %arg3: memref<2xi32, #tpu.memory_space<smem>>) -> (i32, i32, i32) {
    %c0_i32 = arith.constant 0 : i32
    %c0_i32_0 = arith.constant 0 : i32
    %c0_i32_1 = arith.constant 0 : i32
    return %arg0, %c0_i32, %c0_i32_0 : i32, i32, i32
  }
  func.func @transform_6(%arg0: i32, %arg1: i32, %arg2: memref<2xi32, #tpu.memory_space<smem>>, %arg3: memref<2xi32, #tpu.memory_space<smem>>) -> (i32, i32, i32) {
    %c0_i32 = arith.constant 0 : i32
    %c0_i32_0 = arith.constant 0 : i32
    %c0_i32_1 = arith.constant 0 : i32
    return %arg0, %c0_i32, %c0_i32_0 : i32, i32, i32
  }
  func.func @transform_7(%arg0: i32, %arg1: i32, %arg2: memref<2xi32, #tpu.memory_space<smem>>, %arg3: memref<2xi32, #tpu.memory_space<smem>>) -> (i32, i32, i32) {
    %c0_i32 = arith.constant 0 : i32
    %c0_i32_0 = arith.constant 0 : i32
    %c0_i32_1 = arith.constant 0 : i32
    return %arg0, %c0_i32, %c0_i32_0 : i32, i32, i32
  }
  func.func @transform_8(%arg0: i32, %arg1: i32, %arg2: memref<2xi32, #tpu.memory_space<smem>>, %arg3: memref<2xi32, #tpu.memory_space<smem>>) -> (i32, i32, i32) {
    %c0_i32 = arith.constant 0 : i32
    %c0_i32_0 = arith.constant 0 : i32
    %c0_i32_1 = arith.constant 0 : i32
    return %arg0, %c0_i32, %c0_i32_0 : i32, i32, i32
  }
  func.func @transform_9(%arg0: i32, %arg1: i32, %arg2: memref<2xi32, #tpu.memory_space<smem>>, %arg3: memref<2xi32, #tpu.memory_space<smem>>) -> (i32, i32, i32) {
    %c0_i32 = arith.constant 0 : i32
    %c0_i32_0 = arith.constant 0 : i32
    %c0_i32_1 = arith.constant 0 : i32
    return %arg0, %c0_i32, %c0_i32_0 : i32, i32, i32
  }
}

</mosaic_0001>

<bundles_post_ra>
// kernel: tpu_custom_call.1
= control target key start
LH: loop header
LB: loop body
LE: loop exit
PB: predicated region body
PF: predicated region fallthrough
CT: control target
= control target key end

     0   :  { %s1313_s0 = inlined_call_operand.vmem [shape: s32[2], index: 0, kind: input, shape index: {}]   ;;  %s1314_s2 = inlined_call_operand.vmem [shape: f32[2,16,8], index: 2, kind: input, shape index: {}]   ;;  %s1315_s3 = inlined_call_operand.vmem [shape: f32[2,16,8], index: 3, kind: input, shape index: {}]   ;;  %s1316_s4 = inlined_call_operand.vmem [shape: f32[2,16,8], index: 4, kind: input, shape index: {}]   ;;  %s1317_s5 = inlined_call_operand.vmem [shape: f32[2,1,16], index: 5, kind: input, shape index: {}]   ;;  %s1318_s6 = inlined_call_operand.vmem [shape: f32[2,1,16], index: 6, kind: input, shape index: {}]   ;;  %s1319_s7 = inlined_call_operand.vmem [shape: f32[2,1,16], index: 7, kind: input, shape index: {}]   ;;  %s1320_s8 = inlined_call_operand.vmem [shape: f32[2,1,16], index: 8, kind: input, shape index: {}]   ;;  %s1321_s9 = inlined_call_operand.vmem [shape: f32[2,1,8], index: 9, kind: input, shape index: {}]   ;;  %s1322_s10 = inlined_call_operand.vmem [shape: f32[2,1,8], index: 10, kind: input, shape index: {}]   ;;  %s1323_s11 = inlined_call_operand.hbm [shape: f32[2,1,128], index: 11, kind: output, shape index: {}]   ;;  %s1324_s1 = inlined_call_operand.vmem [shape: s32[2], index: 1, kind: input, shape index: {}]  }
   0x1   :  { %1327 = sst [smem:[#allocation14_spill]] %s1317_s5  ;;  %s16_s19 = sshll.u32 %s1313_s0, 4  ;;  %s17_s19 = int_to_ptr.vmem [resolvable:$true] %s16_s19 }
   0x2   :  { %1328 = sst [smem:[#allocation15_spill]] %s1318_s6  ;;  %s20_s22 = sshll.u32 %s1324_s1, 4  ;;  %s21_s22 = int_to_ptr.vmem [resolvable:$true] %s20_s22 }
   0x3   :  { %s949_s23 = scalar_lea.vmem %s17_s19, 16  ;;  %p954_p1 = scmp.lt.s32.totalorder %s17_s19, %s17_s19 }
   0x4   :  { %p950_p0 = scmp.ne.s32.totalorder %s17_s19, %s949_s23  ;;  %p955_p2 = scmp.lt.s32.totalorder %s949_s23, %s949_s23 }
   0x6   :  { %p956_p3 = por %p955_p2, %p954_p1 }
   0x8   :  { %p957_p4 = pnand %p956_p3, %p950_p0 }
   0xa   :  { %960 = shalt.err (!%p957_p4)  }
   0xb   :  { %s1053_s24 = smov [#allocation5]   ;;  %s961_s25 = scalar_lea.vmem %s21_s22, 16 }
   0xc   :  { %19 = dma.vmem_to_smem %s17_s19, 16, %s1053_s24, [#allocation4] }
   0xd   :  { %p962_p5 = scmp.ne.s32.totalorder %s21_s22, %s961_s25  ;;  %p966_p6 = scmp.lt.s32.totalorder %s21_s22, %s21_s22 }
   0xe   :  { %p967_p7 = scmp.lt.s32.totalorder %s961_s25, %s961_s25 }
  0x10   :  { %p968_p8 = por %p967_p7, %p966_p6 }
  0x12   :  { %p969_p9 = pnand %p968_p8, %p962_p5 }
  0x14   :  { %972 = shalt.err (!%p969_p9)  }
  0x15   :  { %s1054_s0 = smov [#allocation6]  }
  0x16   :  { %23 = dma.vmem_to_smem %s21_s22, 16, %s1054_s0, [#allocation4] }
  0x17   :  { %1023 = dma.done.wait [#allocation4], 32 }
  0x18   :  { %1024 = vsyncadd [#allocation4], 4294967264 }
  0x19   :  { %25 = sfence }
  0x1a   :  { %26 = vsyncpa [#allocation8], 0 }
  0x1b   :  { %28 = vsyncpa [#allocation8 + $0x1], 0  ;;  %s1123_s1 = smov 0   ;;  %s1125_s26 = smov 0  }
  0x1c   :  { %s1127_s27 = smov 0   ;;  %s1129_s28 = smov 0  }
  0x1d   :  { %s1131_s29 = smov 0   ;;  %s1133_s30 = smov 0  }
  0x1e LB: > { %1329 = sst [smem:[#allocation11_spill]] %s1047_s29  ;;  %s862_s12 = sadd.s32 4294967295, %s1051_s30   ;;  %s1051_s30 = sphi %s1133_s30, %s34_s30   ;;  %s1047_s29 = sphi %s1131_s29, %s1344_s29   ;;  %s1043_s28 = sphi %s1129_s28, %s1343_s28   ;;  %s1039_s27 = sphi %s1127_s27, %s1347_s27   ;;  %s1035_s26 = sphi %s1125_s26, %s1346_s26   ;;  %s1031_s1 = sphi %s1123_s1, %s1345_s1  }
  0x1f   : > { %s863_s13 = sadd.s32 4294967294, %s1051_s30   ;;  %s46_s14 = sadd.s32 1, %s1047_s29 }
  0x20   : > { %s293_s15 = sadd.s32 1, %s1039_s27  ;;  %p48_p10 = scmp.ge.s32.totalorder %s46_s14, 2 }
  0x21   : > { %p303_p11 = scmp.ne.s32.totalorder %s1039_s27, %s1035_s26  ;;  %p304_p12 = scmp.eq.s32.totalorder %s862_s12, 1 }
  0x22   : > { %p309_p13 = scmp.ne.s32.totalorder %s1035_s26, %s1031_s1  ;;  %s1349_s14 = smov (%p48_p10, %s46_s14), 0 }
  0x23   : > { %1330 = sst [smem:[#allocation12_spill]] %s1349_s14  ;;  %p1163_p0 = por %p304_p12, %p303_p11 }
  0x24   : > { %p310_p1 = scmp.eq.s32.totalorder %s863_s13, 1  ;;  %s290_s17 = ssub.s32 %s1047_s29, %s1349_s14 }
  0x25   : > { %p866_p2 = scmp.ge.s32.totalorder %s1051_s30, 1  ;;  %p291_p3 = scmp.eq.s32.totalorder %s290_s17, 0 }
  0x26   : > { %p1170_p4 = por %p310_p1, %p309_p13  ;;  %p403_p5 = scmp.lt.s32.totalorder %s1051_s30, 3 }
  0x27   : > { %s1176_s19 = scalar_select %p291_p3, %s1039_s27, %s293_s15  }
  0x28   : > { %p404_p6 = pnand %p866_p2, %p403_p5 }
  0x29   : > { %1333 = sst [smem:[#allocation13_spill]] %s1176_s19  ;;  %p479_p7 = scmp.lt.s32.totalorder (!%p404_p6), %s1043_s28, 1 }
  0x2a   : > { %407 = sbr.rel (%p404_p6) target bundleno = 313 (0x139), region = 56  ;;  %s1180_s20 = sld [smem:[#allocation5 + %s1043_s28]] (!%p404_p6) }
  0x2b   : > { %s597_s21 = sld [smem:[#allocation5 + %s1043_s28]] (!%p404_p6)  ;;  %s476_s0 = sand.u32 (!%p404_p6), 1, %s1035_s26  }
  0x2c   : > { %s1334_s5 = sld [smem:[#allocation14_spill]] (!%p404_p6)  ;;  %s873_s14 = sshll.u32 (!%p404_p6), %s1043_s28, 4 }
  0x2d   : > { %s1335_s6 = sld [smem:[#allocation15_spill]] (!%p404_p6) }
  0x2e   : > { %s600_s23 = sld [smem:[#allocation6 + %s1043_s28]] (!%p404_p6) }
  0x2f   : > { %v540_v0 = vlaneseq  ;;  %vm530_vm0 = vcmask 57344   ;;  %s1184_s22 = scalar_select %p479_p7, %s1043_s28, 1  ;;  %v1055_v2 = vmov 0.0   ;;  %vm630_vm2 = vcmask 122880  }
  0x30   : > { %531 = vst.msk [vmem:[#allocation2] sm:$0x1] %vm530_vm0, %v1055_v2  ;;  %532 = vst.msk [vmem:[#allocation3] sm:$0x1] %vm530_vm0, %v1055_v2  ;;  %v547_v7 = vstv %s1180_s20  ;;  %vm567_vm5 = vcmask 64512   ;;  %s477_s20 = scalar_lea.vmem [#allocation7], %s476_s0 }
  0x31   : > { %v541_v1 = vshrl.u32 %v540_v0, 7  ;;  %v1196_v3 = vand.u32 127, %v540_v0  ;;  %s876_s15 = sshll.u32 %s1184_s22, 4  ;;  %s516_s29 = scalar_lea.vmem %s1319_s7, %s1184_s22  ;;  %v598_v10 = vstv %s597_s21 }
  0x32   : > { %s510_s25 = scalar_lea.vmem %s1334_s5, %s1184_s22  ;;  %s486_s24 = scalar_lea.vmem %s1314_s2, %s876_s15  ;;  %v641_v9 = vld [vmem:[%s516_s29] sm:$0x1] }
  0x33   : > { %s513_s13 = scalar_lea.vmem %s1335_s6, %s1184_s22  ;;  %v542_v4 = vadd.s32 8, %v541_v1  ;;  %v625_v5 = vld [vmem:[%s510_s25] sm:$0x1]  ;;  %s496_s12 = scalar_lea.vmem %s1315_s3, %s876_s15  ;;  %v534_v12 = vld [vmem:[%s486_s24 + $0x8] sm:$0xff]  ;;  %vm1218_vm1 = vcmp.lt.s32.totalorder %v1196_v3, %v598_v10  ;;  %vm1226_vm3 = vcmp.lt.s32.totalorder %v541_v1, %v547_v7  ;;  %vm678_vm7 = vcmp.eq.s32.totalorder %v1196_v3, 4 }
  0x34   : > { %v626_v6 = vld [vmem:[%s513_s13] sm:$0x1]  ;;  %s506_s6 = scalar_lea.vmem %s1316_s4, %s876_s15  ;;  %s519_s17 = scalar_lea.vmem %s1320_s8, %s1184_s22  ;;  %v536_v16 = vld [vmem:[%s496_s12 + $0x8] sm:$0xff]  ;;  %vm677_vm8 = vcmp.eq.s32.totalorder %v1196_v3, 3  ;;  %vm676_vm9 = vcmp.eq.s32.totalorder %v1196_v3, 2  ;;  %vm675_vm10 = vcmp.eq.s32.totalorder %v1196_v3, 1 }
  0x35   : > { %v627_v8 = vsub.f32 %v625_v5, %v626_v6  ;;  %v533_v11 = vld [vmem:[%s486_s24] sm:$0xff]  ;;  %v538_v18 = vld [vmem:[%s506_s6 + $0x8] sm:$0xff]  ;;  %s525_s19 = scalar_lea.vmem %s1322_s10, %s1184_s22  ;;  %vm1230_vm4 = vcmp.lt.s32.totalorder %v542_v4, %v547_v7  ;;  %v551_v22 = vsub.f32 %v534_v12, %v536_v16  ;;  %s522_s15 = scalar_lea.vmem %s1321_s9, %s1184_s22  ;;  %v601_v5 = vstv %s600_s23 }
  0x36   : > { %v535_v13 = vld [vmem:[%s496_s12] sm:$0xff]  ;;  %vm602_vm6 = vcmp.lt.s32.totalorder %v1196_v3, %v601_v5  ;;  %vm674_vm11 = vcmp.eq.s32.totalorder %v1196_v3, 0  ;;  %s691_s28 = scalar_lea.sflag [#allocation8], %s476_s0  ;;  %s1056_s21 = smov [#allocation7]  }
  0x37   : > { %v628_v15 = vmul.f32 %v627_v8, %v627_v8  ;;  %v537_v17 = vld [vmem:[%s506_s6] sm:$0xff]  ;;  %v550_v19 = vsub.f32 %v533_v11, %v535_v13  ;;  %v553_v29 = vand.u32 2147483647, %v551_v22  ;;  %v561_v30 = vadd.f32 %v551_v22, %v538_v18 }
  0x38   : > { %v642_v23 = vld [vmem:[%s519_s17] sm:$0x1]  ;;  %v580_v61 = vld [vmem:[#allocation3] sm:$0x1]  ;;  %s703_s17 = sshll.u32 %s477_s20, 4  ;;  %s704_s17 = int_to_ptr.vmem [resolvable:$true] %s703_s17 }
  0x39   : > { %v629_v24 = vsel %vm1218_vm1, %v628_v15, 0.0  ;;  %v552_v25 = vand.u32 2147483647, %v550_v19  ;;  %v560_v26 = vadd.f32 %v550_v19, %v537_v17  ;;  %v643_v27 = vsub.f32 %v641_v9, %v642_v23  ;;  %v657_v31 = vld [vmem:[%s525_s19] sm:$0x1]  ;;  %s1273_s19 = scalar_lea.hbm %s1323_s11, %s873_s14  ;;  %s973_s6 = scalar_lea.vmem %s704_s17, 16 }
  0x3a   : > { %v631_v28 = vsel %vm630_vm2, %v629_v24, 0.0  ;;  %v658_v35 = vadd.f32 1.0, %v657_v31  ;;  %v559_v36 = vsel %vm1230_vm4, %v553_v29, 0.0  ;;  %v563_v37 = vand.u32 2147483647, %v561_v30  ;;  %p974_p8 = scmp.ne.s32.totalorder %s704_s17, %s973_s6 }
  0x3b   : > { %632 = vadd.xlane.f32.xlu1 %v631_v28  ;;  %v558_v32 = vsel %vm1226_vm3, %v552_v25, 0.0  ;;  %v562_v33 = vand.u32 2147483647, %v560_v26  ;;  %v644_v34 = vmul.f32 %v643_v27, %v643_v27  ;;  %v569_v40 = vsel %vm567_vm5, %v559_v36, 0.0  ;;  %v566_v57 = vld [vmem:[#allocation2] sm:$0x1] }
  0x3c   : > { %v568_v38 = vsel %vm567_vm5, %v558_v32, 0.0  ;;  %947 = vlog2.f32 %v658_v35  ;;  %v565_v42 = vsel %vm1230_vm4, %v563_v37, 0.0  ;;  %v656_v2 = vld [vmem:[%s522_s15] sm:$0x1]  ;;  %p975_p9 = pnand %p974_p8, %p1163_p0  ;;  %s977_s15 = sshll.u32 %s1056_s21, 4  ;;  %s978_s15 = int_to_ptr.vmem [resolvable:$false] %s977_s15 }
  0x3d   : > { %v564_v39 = vsel %vm1226_vm3, %v562_v33, 0.0  ;;  %v645_v41 = vsel %vm1218_vm1, %v644_v34, 0.0  ;;  %v570_v43 = vadd.f32 %v569_v40, %v568_v38  ;;  %v582_v46 = vsel %vm567_vm5, %v565_v42, 0.0  ;;  %s979_s23 = scalar_lea.vmem %s978_s15, 32  ;;  %p980_p11 = scmp.lt.s32.totalorder %s704_s17, %s978_s15 }
  0x3e   : > { %v581_v44 = vsel %vm567_vm5, %v564_v39, 0.0  ;;  %v646_v45 = vsel %vm630_vm2, %v645_v41, 0.0  ;;  %p976_p10 = pneg %p975_p9  ;;  %p981_p12 = scmp.lt.s32.totalorder %s979_s23, %s973_s6 }
  0x3f   : > { %647 = vadd.xlane.f32.xlu1 %v646_v45  ;;  %v583_v47 = vadd.f32 %v582_v46, %v581_v44  ;;  %v571_v48 = vrot.slane %v570_v43, 4 }
  0x40   : > { %p982_p13 = por %p981_p12, %p980_p11 }
  0x41   : > { %v572_v49 = vadd.f32 %v571_v48, %v570_v43  ;;  %v584_v50 = vrot.slane %v583_v47, 4 }
  0x42   : > { %p983_p1 = pnand %p982_p13, %p976_p10 }
  0x43   : > { %v573_v51 = vrot.slane %v572_v49, 2  ;;  %v585_v52 = vadd.f32 %v584_v50, %v583_v47 }
  0x45   : > { %v574_v53 = vadd.f32 %v573_v51, %v572_v49  ;;  %v586_v54 = vrot.slane %v585_v52, 2 }
  0x47   : > { %v575_v55 = vrot.slane %v574_v53, 1  ;;  %v587_v56 = vadd.f32 %v586_v54, %v585_v52 }
  0x49   : > { %v948_v58 = vpop.eup %947  ;;  %v576_v59 = vadd.f32 %v575_v55, %v574_v53  ;;  %v588_v60 = vrot.slane %v587_v56, 1 }
  0x4a   : > { %v660_v0 = vmul.f32 0.6931472, %v948_v58 }
  0x4b   : > { %v577_v62 = vadd.f32 %v576_v59, %v566_v57  ;;  %v589_v63 = vadd.f32 %v588_v60, %v587_v56 }
  0x4c   : > { %v661_v4 = vsub.f32 %v656_v2, %v660_v0 }
  0x4d   : > { %579 = vst.msk [vmem:[#allocation2] sm:$0x1] %vm530_vm0, %v577_v62  ;;  %v590_v1 = vadd.f32 %v589_v63, %v580_v61 }
  0x4e   : > { %v662_v7 = vmul.f32 %v661_v4, %v661_v4 }
  0x4f   : > { %591 = vst.msk [vmem:[#allocation3] sm:$0x1] %vm530_vm0, %v590_v1 }
  0x50   : > { %v663_v11 = vsel %vm602_vm6, %v662_v7, 0.0 }
  0x51   : > { %v664_v12 = vsel %vm530_vm0, %v663_v11, 0.0 }
  0x54   : > { %v603_v6 = vld [vmem:[#allocation2] sm:$0x1] }
  0x55   : > { %v604_v8 = vsel %vm530_vm0, %v603_v6, 0.0 }
  0x56   : > { %605 = vadd.xlane.f32.xlu0 %v604_v8  ;;  %v614_v9 = vld [vmem:[#allocation3] sm:$0x1] }
  0x57   : > { %v615_v10 = vsel %vm530_vm0, %v614_v9, 0.0 }
  0x5a   : > { %616 = vadd.xlane.f32.xlu0 %v615_v10 }
  0x5e   : > { %665 = vadd.xlane.f32.xlu0 %v664_v12 }
  0xc4   : > { %v633_v13 = vpop.xlane.xlu1 %632 }
  0xc5   : > { %v634_v15 = vrot.slane %v633_v13, 4 }
  0xc7   : > { %v635_v17 = vadd.f32 %v634_v15, %v633_v13 }
  0xc8   : > { %v648_v14 = vpop.xlane.xlu1 %647 }
  0xc9   : > { %v649_v16 = vrot.slane %v648_v14, 4  ;;  %v636_v22 = vrot.slane %v635_v17, 2 }
  0xcb   : > { %v650_v20 = vadd.f32 %v649_v16, %v648_v14  ;;  %v637_v30 = vadd.f32 %v636_v22, %v635_v17 }
  0xcd   : > { %v651_v25 = vrot.slane %v650_v20, 2  ;;  %v638_v38 = vrot.slane %v637_v30, 1 }
  0xcf   : > { %v652_v31 = vadd.f32 %v651_v25, %v650_v20  ;;  %v639_v44 = vadd.f32 %v638_v38, %v637_v30 }
  0xd1   : > { %v653_v41 = vrot.slane %v652_v31, 1 }
  0xd3   : > { %v654_v45 = vadd.f32 %v653_v41, %v652_v31 }
  0xdf   : > { %v606_v18 = vpop.xlane.xlu0 %605 }
  0xe0   : > { %v607_v19 = vrot.slane %v606_v18, 4 }
  0xe2   : > { %v608_v21 = vadd.f32 %v607_v19, %v606_v18 }
  0xe3   : > { %v617_v23 = vpop.xlane.xlu0 %616 }
  0xe4   : > { %v609_v24 = vrot.slane %v608_v21, 2  ;;  %v618_v26 = vrot.slane %v617_v23, 4 }
  0xe6   : > { %v619_v27 = vadd.f32 %v618_v26, %v617_v23  ;;  %v610_v28 = vadd.f32 %v609_v24, %v608_v21 }
  0xe7   : > { %v666_v29 = vpop.xlane.xlu0 %665 }
  0xe8   : > { %v620_v32 = vrot.slane %v619_v27, 2  ;;  %v667_v33 = vrot.slane %v666_v29, 4  ;;  %v611_v34 = vrot.slane %v610_v28, 1 }
  0xea   : > { %v668_v35 = vadd.f32 %v667_v33, %v666_v29  ;;  %v612_v36 = vadd.f32 %v611_v34, %v610_v28  ;;  %v621_v37 = vadd.f32 %v620_v32, %v619_v27 }
  0xec   : > { %v669_v39 = vrot.slane %v668_v35, 2  ;;  %879 = vpush %v612_v36  ;;  %v622_v40 = vrot.slane %v621_v37, 1 }
  0xee   : > { %v670_v42 = vadd.f32 %v669_v39, %v668_v35  ;;  %v623_v43 = vadd.f32 %v622_v40, %v621_v37 }
  0xf0   : > { %881 = vpush %v623_v43  ;;  %v671_v46 = vrot.slane %v670_v42, 1 }
  0xf1   : > { %883 = vpush %v639_v44 }
  0xf2   : > { %885 = vpush %v654_v45  ;;  %v672_v47 = vadd.f32 %v671_v46, %v670_v42 }
  0xf4   : > { %887 = vpush %v672_v47 }
 0x11d   : > { %s880_s22 = spop %879 }
 0x11e   : > { %v687_v55 = vstv %s880_s22 }
 0x121   : > { %s882_s24 = spop %881 }
 0x122   : > { %s884_s12 = spop %883  ;;  %v685_v53 = vstv %s882_s24 }
 0x123   : > { %s886_s25 = spop %885  ;;  %v683_v51 = vstv %s884_s12 }
 0x124   : > { %v681_v49 = vstv %s886_s25 }
 0x125   : > { %s888_s13 = spop %887 }
 0x126   : > { %v679_v48 = vstv %s888_s13 }
 0x127   : > { %v680_v50 = vsel %vm678_vm7, %v679_v48, 0.0 }
 0x128   : > { %v682_v52 = vsel %vm677_vm8, %v681_v49, %v680_v50 }
 0x129   : > { %v684_v54 = vsel %vm676_vm9, %v683_v51, %v682_v52 }
 0x12a   : > { %v686_v56 = vsel %vm675_vm10, %v685_v53, %v684_v54 }
 0x12b   : > { %v688_v57 = vsel %vm674_vm11, %v687_v55, %v686_v56 }
 0x12c   : > { %689 = vst [vmem:[%s477_s20] sm:$0x1] %v688_v57 }
 0x12d   : > { %986 = shalt.err (!%p983_p1)
}
 0x12e   : > { %s987_s22 = scalar_lea.hbm %s1273_s19, 16  ;;  %s991_s12 = scalar_lea.hbm %s1323_s11, 32 }
 0x12f   : > { %p988_p2 = scmp.ne.s32.totalorder %s1273_s19, %s987_s22  ;;  %p992_p6 = scmp.lt.s32.totalorder %s1273_s19, %s1323_s11 }
 0x130   : > { %p993_p7 = scmp.lt.s32.totalorder %s991_s12, %s987_s22 }
 0x131   : > { %p989_p3 = pnand %p988_p2, %p1163_p0 }
 0x132   : > { %p994_p8 = por %p993_p7, %p992_p6 }
 0x133   : > { %p990_p5 = pneg %p989_p3 }
 0x135   : > { %p995_p9 = pnand %p994_p8, %p990_p5 }
 0x137   : > { %998 = shalt.err (!%p995_p9)
}
 0x138   : > { %889 = dma.vmem_to_hbm [thread:$0]  (%p1163_p0), %s704_s17, 16, %s1273_s19, %s691_s28  }
 0x139 PF: > { %p895_p10 = scmp.ge.s32.totalorder %s1051_s30, 2  ;;  %s715_s14 = sand.u32 1, %s1031_s1  }
 0x13a   : > { %s716_s20 = scalar_lea.sflag [#allocation8], %s715_s14 }
 0x13b   : > { %p892_p11 = pnand %p895_p10, %p1170_p4 }
 0x13d   : > { %p893_p12 = pneg %p892_p11 }
 0x13f   : > { %1026 = dma.done.wait (%p893_p12), %s716_s20, 16  }
 0x140   : > { %1028 = vsyncadd (%p893_p12), %s716_s20, 4294967280  ;;  %s34_s30 = sadd.s32 1, %s1051_s30   ;;  %s1342_s16 = sld [smem:[#allocation13_spill]] }
 0x141   : > { %p31_p13 = scmp.ge.s32.totalorder %s34_s30, 4   ;;  %s1343_s28 = sld [smem:[#allocation11_spill]] }
 0x142   : > { %s1344_s29 = sld [smem:[#allocation12_spill]]  ;;  %s1345_s1 = smov %s1035_s26 }
 0x143   : > { %s1346_s26 = smov %s1039_s27  ;;  %33 = sbr.rel (!%p31_p13) target bundleno = 30 (0x1e), region = 123 }
 0x146   : > { %s1347_s27 = smov %s1342_s16 }
 0x148   :  { %720 = vsyncpa [#allocation8], 1 }
 0x149   :  { %722 = vsyncpa [#allocation8 + $0x1], 1 }

</bundles_post_ra>
